<compile_context>
chip_gen: v5e
topology: v5e:2x2
jax: 0.10.0
libtpu: 0.0.40
codegen_flags: <defaults>
</compile_context>

<pallas_src>
import functools

import jax
import jax.numpy as jnp
import numpy as np
from jax.experimental import pallas as pl
from jax.experimental.pallas import tpu as pltpu


def _round_up(x, m):
    return ((x + m - 1) // m) * m


def _output_kernel(xa_ref, xb_ref, w_ref, shift_ref, o_ref, *, w2, tile_q):
    # xa_ref/xb_ref: (1, Cin, tile_q) bf16 -- flattened-input tiles i and i+1
    # w_ref:         (9, Cout, Cin) bf16  -- BN-scale-folded weights, one slab per tap
    # shift_ref:     (Cout, 1) f32        -- BN shift
    # o_ref:         (1, Cout, tile_q) f32
    cout = w_ref.shape[1]
    # current tile + next tile -> covers the 3x3 halo (max offset 2*w2+2 <= tile_q)
    x = jnp.concatenate([xa_ref[0], xb_ref[0]], axis=-1)          # (Cin, 2*tile_q)
    acc = jnp.zeros((cout, tile_q), jnp.float32)
    for t in range(9):                                            # statically unrolled
        kh, kw = t // 3, t % 3
        off = kh * w2 + kw                                        # static lane offset
        acc = acc + jnp.dot(w_ref[t], x[:, off:off + tile_q],
                            preferred_element_type=jnp.float32)
    y = acc + shift_ref[...]                                      # BN (scale folded in w)
    y = jnp.maximum(y, 0.0)                                       # ReLU
    o_ref[0] = pl.reciprocal(1.0 + jnp.exp(-y), approx=True)      # Sigmoid (exp+rcp on EUP)


def output_forward(x_nchw, conv_w, gamma, beta, run_mean, run_var,
                   eps=1e-5, max_tile_q=1024):
    N, Cin, H, W = x_nchw.shape
    Cout = conv_w.shape[0]
    W2 = W + 2                      # padded width
    Q = H * W2                      # flattened output length (incl. 2 junk cols per row)
    halo = 2 * W2 + 2               # largest tap offset into the flattened input

    # lane-tile size: multiple of 128, >= halo, capped by a VMEM budget
    def _vmem_bytes(t):             # 2 input operands + output, double-buffered
        return 2 * 2 * (Cin * t * 2) + 2 * (Cout * t * 4)
    min_tile = max(128, _round_up(halo, 128))
    tile_q = max(min(max_tile_q, _round_up(Q, 128)), min_tile)
    while tile_q > min_tile and _vmem_bytes(tile_q) > 24 * 1024 * 1024:
        tile_q -= 128
    assert tile_q >= halo, "spatial width too large for max_tile_q; raise max_tile_q"

    nq = -(-Q // tile_q)            # cdiv
    Qp = nq * tile_q
    Lin = (nq + 1) * tile_q         # extra block so index_map i+1 is always in range

    # zero-pad spatially (same padding Conv2d(3,1,1) implies), flatten, zero-pad tail
    xp = jnp.pad(x_nchw.astype(jnp.float32),
                 ((0, 0), (0, 0), (1, 1), (1, 1)))                # (N, Cin, H+2, W2)
    x_flat = xp.reshape(N, Cin, (H + 2) * W2)
    x_flat = jnp.pad(x_flat, ((0, 0), (0, 0), (0, Lin - (H + 2) * W2)))
    x_flat = x_flat.astype(jnp.bfloat16)

    # fold BatchNorm (eval mode) scale into the conv weight; keep the shift separate
    scale = gamma / jnp.sqrt(run_var + eps)                       # (Cout,)
    shift = (beta - run_mean * scale).reshape(Cout, 1).astype(jnp.float32)
    wf = conv_w.astype(jnp.float32) * scale[:, None, None, None]  # (Cout, Cin, 3, 3)
    w_taps = jnp.transpose(wf, (2, 3, 0, 1)).reshape(9, Cout, Cin).astype(jnp.bfloat16)

    kernel = functools.partial(_output_kernel, w2=W2, tile_q=tile_q)

    out_buf = pl.pallas_call(
        kernel,
        out_shape=jax.ShapeDtypeStruct((N, Cout, Qp), jnp.float32),
        grid_spec=pltpu.PrefetchScalarGridSpec(
            num_scalar_prefetch=0,
            grid=(N, nq),
            in_specs=[
                pl.BlockSpec((1, Cin, tile_q), lambda n, i: (n, 0, i)),      # tile i
                pl.BlockSpec((1, Cin, tile_q), lambda n, i: (n, 0, i + 1)),  # tile i+1 (halo)
                pl.BlockSpec((9, Cout, Cin), lambda n, i: (0, 0, 0)),        # folded weights
                pl.BlockSpec((Cout, 1), lambda n, i: (0, 0)),                # BN shift
            ],
            out_specs=pl.BlockSpec((1, Cout, tile_q), lambda n, i: (n, 0, i)),
        ),
        compiler_params=pltpu.CompilerParams(
            dimension_semantics=("parallel", "parallel"),
            vmem_limit_bytes=32 * 1024 * 1024),
    )(x_flat, x_flat, w_taps, shift)

    # drop padded tail and the 2 junk columns per row; layout is already NCHW
    return out_buf[:, :, :Q].reshape(N, Cout, H, W2)[:, :, :, :W]


def _reference(x_nchw, conv_w, gamma, beta, run_mean, run_var, eps=1e-5):
    y = jax.lax.conv_general_dilated(
        x_nchw, conv_w, window_strides=(1, 1), padding=((1, 1), (1, 1)),
        dimension_numbers=("NCHW", "OIHW", "NCHW"))
    scale = (gamma / jnp.sqrt(run_var + eps)).reshape(1, -1, 1, 1)
    shift = (beta - run_mean * gamma / jnp.sqrt(run_var + eps)).reshape(1, -1, 1, 1)
    y = y * scale + shift
    return jax.nn.sigmoid(jnp.maximum(y, 0.0))


if __name__ == "__main__":
    key = jax.random.PRNGKey(0)
    k1, k2, k3, k4, k5, k6 = jax.random.split(key, 6)

    N, Cin, Cout, H, W = 2, 4, 8, 16, 16
    x = jax.random.normal(k1, (N, Cin, H, W), jnp.float32)
    conv_w = 0.1 * jax.random.normal(k2, (Cout, Cin, 3, 3), jnp.float32)
    gamma = 1.0 + 0.1 * jax.random.normal(k3, (Cout,), jnp.float32)
    beta = 0.1 * jax.random.normal(k4, (Cout,), jnp.float32)
    run_mean = 0.1 * jax.random.normal(k5, (Cout,), jnp.float32)
    run_var = jnp.abs(jax.random.normal(k6, (Cout,), jnp.float32)) + 0.5

    # TODO(synk): BatchNorm2d is applied with running statistics (eval mode);
    # PyTorch default training-mode batch-statistic computation is not reproduced.
    out = output_forward(x, conv_w, gamma, beta, run_mean, run_var)
    out = jax.block_until_ready(out)

    ref = _reference(x, conv_w, gamma, beta, run_mean, run_var)
    assert out.shape == (N, Cout, H, W)
    # bf16 MXU operands + approx reciprocal -> loosened (but still tight) tolerance
    np.testing.assert_allclose(np.asarray(out), np.asarray(ref),
                               rtol=2e-2, atol=2e-2)

    print("KERNEL_OK")
</pallas_src>

<mosaic_0001>
module attributes {stable_mosaic.version = 11 : i64} {
  func.func @_output_kernel(%arg0: i32, %arg1: i32, %arg2: memref<1x4x384xbf16, #tpu.memory_space<vmem>>, %arg3: memref<1x4x384xbf16, #tpu.memory_space<vmem>>, %arg4: memref<9x8x4xbf16, #tpu.memory_space<vmem>>, %arg5: memref<8x1xf32, #tpu.memory_space<vmem>>, %arg6: memref<1x8x384xf32, #tpu.memory_space<vmem>>) attributes {dimension_semantics = [#tpu.dimension_semantics<parallel>, #tpu.dimension_semantics<parallel>], iteration_bounds = array<i64: 2, 1>, scalar_prefetch = 0 : i64, scratch_operands = 0 : i64, tpu.core_type = #tpu.core_type<tc>, window_params = [{transform_indices = @transform_0, window_bounds = array<i64: 1, 4, 384>}, {transform_indices = @transform_1, window_bounds = array<i64: 1, 4, 384>}, {pipeline_mode = #tpu.pipeline_mode<synchronous>, transform_indices = @transform_2, window_bounds = array<i64: 9, 8, 4>}, {pipeline_mode = #tpu.pipeline_mode<synchronous>, transform_indices = @transform_3, window_bounds = array<i64: 8, 1>}, {transform_indices = @transform_4, window_bounds = array<i64: 1, 8, 384>}]} {
    %c0 = arith.constant 0 : index
    %c0_0 = arith.constant 0 : index
    %c0_1 = arith.constant 0 : index
    %0 = vector.load %arg2[%c0, %c0_0, %c0_1] : memref<1x4x384xbf16, #tpu.memory_space<vmem>>, vector<1x4x384xbf16>
    %1 = vector.shape_cast %0 : vector<1x4x384xbf16> to vector<4x384xbf16>
    %c0_2 = arith.constant 0 : index
    %c0_3 = arith.constant 0 : index
    %c0_4 = arith.constant 0 : index
    %2 = vector.load %arg3[%c0_2, %c0_3, %c0_4] : memref<1x4x384xbf16, #tpu.memory_space<vmem>>, vector<1x4x384xbf16>
    %3 = vector.shape_cast %2 : vector<1x4x384xbf16> to vector<4x384xbf16>
    %4 = tpu.concatenate %1, %3 in 1 : vector<4x384xbf16>, vector<4x384xbf16> -> vector<4x768xbf16>
    %cst = arith.constant 0.000000e+00 : f32
    %5 = vector.broadcast %cst : f32 to vector<8x384xf32>
    %c0_5 = arith.constant 0 : index
    %c0_6 = arith.constant 0 : index
    %c0_7 = arith.constant 0 : index
    %6 = vector.load %arg4[%c0_5, %c0_6, %c0_7] : memref<9x8x4xbf16, #tpu.memory_space<vmem>>, vector<1x8x4xbf16>
    %7 = vector.shape_cast %6 : vector<1x8x4xbf16> to vector<8x4xbf16>
    %8 = vector.extract_strided_slice %4 {offsets = [0, 0], sizes = [4, 384], strides = [1, 1]} : vector<4x768xbf16> to vector<4x384xbf16>
    %cst_8 = arith.constant dense<0.000000e+00> : vector<8x384xf32>
    %9 = tpu.matmul %7, %8, %cst_8 {dimension_numbers = #tpu.dot_dimension_numbers<[1], [0], [0], [1], [0, 0, 1, 1], [], []>} : vector<8x4xbf16>, vector<4x384xbf16>, vector<8x384xf32> -> vector<8x384xf32>
    %10 = arith.addf %5, %9 : vector<8x384xf32>
    %c1 = arith.constant 1 : index
    %c0_9 = arith.constant 0 : index
    %c0_10 = arith.constant 0 : index
    %11 = vector.load %arg4[%c1, %c0_9, %c0_10] : memref<9x8x4xbf16, #tpu.memory_space<vmem>>, vector<1x8x4xbf16>
    %12 = vector.shape_cast %11 : vector<1x8x4xbf16> to vector<8x4xbf16>
    %13 = vector.extract_strided_slice %4 {offsets = [0, 1], sizes = [4, 384], strides = [1, 1]} : vector<4x768xbf16> to vector<4x384xbf16>
    %cst_11 = arith.constant dense<0.000000e+00> : vector<8x384xf32>
    %14 = tpu.matmul %12, %13, %cst_11 {dimension_numbers = #tpu.dot_dimension_numbers<[1], [0], [0], [1], [0, 0, 1, 1], [], []>} : vector<8x4xbf16>, vector<4x384xbf16>, vector<8x384xf32> -> vector<8x384xf32>
    %15 = arith.addf %10, %14 : vector<8x384xf32>
    %c2 = arith.constant 2 : index
    %c0_12 = arith.constant 0 : index
    %c0_13 = arith.constant 0 : index
    %16 = vector.load %arg4[%c2, %c0_12, %c0_13] : memref<9x8x4xbf16, #tpu.memory_space<vmem>>, vector<1x8x4xbf16>
    %17 = vector.shape_cast %16 : vector<1x8x4xbf16> to vector<8x4xbf16>
    %18 = vector.extract_strided_slice %4 {offsets = [0, 2], sizes = [4, 384], strides = [1, 1]} : vector<4x768xbf16> to vector<4x384xbf16>
    %cst_14 = arith.constant dense<0.000000e+00> : vector<8x384xf32>
    %19 = tpu.matmul %17, %18, %cst_14 {dimension_numbers = #tpu.dot_dimension_numbers<[1], [0], [0], [1], [0, 0, 1, 1], [], []>} : vector<8x4xbf16>, vector<4x384xbf16>, vector<8x384xf32> -> vector<8x384xf32>
    %20 = arith.addf %15, %19 : vector<8x384xf32>
    %c3 = arith.constant 3 : index
    %c0_15 = arith.constant 0 : index
    %c0_16 = arith.constant 0 : index
    %21 = vector.load %arg4[%c3, %c0_15, %c0_16] : memref<9x8x4xbf16, #tpu.memory_space<vmem>>, vector<1x8x4xbf16>
    %22 = vector.shape_cast %21 : vector<1x8x4xbf16> to vector<8x4xbf16>
    %23 = vector.extract_strided_slice %4 {offsets = [0, 18], sizes = [4, 384], strides = [1, 1]} : vector<4x768xbf16> to vector<4x384xbf16>
    %cst_17 = arith.constant dense<0.000000e+00> : vector<8x384xf32>
    %24 = tpu.matmul %22, %23, %cst_17 {dimension_numbers = #tpu.dot_dimension_numbers<[1], [0], [0], [1], [0, 0, 1, 1], [], []>} : vector<8x4xbf16>, vector<4x384xbf16>, vector<8x384xf32> -> vector<8x384xf32>
    %25 = arith.addf %20, %24 : vector<8x384xf32>
    %c4 = arith.constant 4 : index
    %c0_18 = arith.constant 0 : index
    %c0_19 = arith.constant 0 : index
    %26 = vector.load %arg4[%c4, %c0_18, %c0_19] : memref<9x8x4xbf16, #tpu.memory_space<vmem>>, vector<1x8x4xbf16>
    %27 = vector.shape_cast %26 : vector<1x8x4xbf16> to vector<8x4xbf16>
    %28 = vector.extract_strided_slice %4 {offsets = [0, 19], sizes = [4, 384], strides = [1, 1]} : vector<4x768xbf16> to vector<4x384xbf16>
    %cst_20 = arith.constant dense<0.000000e+00> : vector<8x384xf32>
    %29 = tpu.matmul %27, %28, %cst_20 {dimension_numbers = #tpu.dot_dimension_numbers<[1], [0], [0], [1], [0, 0, 1, 1], [], []>} : vector<8x4xbf16>, vector<4x384xbf16>, vector<8x384xf32> -> vector<8x384xf32>
    %30 = arith.addf %25, %29 : vector<8x384xf32>
    %c5 = arith.constant 5 : index
    %c0_21 = arith.constant 0 : index
    %c0_22 = arith.constant 0 : index
    %31 = vector.load %arg4[%c5, %c0_21, %c0_22] : memref<9x8x4xbf16, #tpu.memory_space<vmem>>, vector<1x8x4xbf16>
    %32 = vector.shape_cast %31 : vector<1x8x4xbf16> to vector<8x4xbf16>
    %33 = vector.extract_strided_slice %4 {offsets = [0, 20], sizes = [4, 384], strides = [1, 1]} : vector<4x768xbf16> to vector<4x384xbf16>
    %cst_23 = arith.constant dense<0.000000e+00> : vector<8x384xf32>
    %34 = tpu.matmul %32, %33, %cst_23 {dimension_numbers = #tpu.dot_dimension_numbers<[1], [0], [0], [1], [0, 0, 1, 1], [], []>} : vector<8x4xbf16>, vector<4x384xbf16>, vector<8x384xf32> -> vector<8x384xf32>
    %35 = arith.addf %30, %34 : vector<8x384xf32>
    %c6 = arith.constant 6 : index
    %c0_24 = arith.constant 0 : index
    %c0_25 = arith.constant 0 : index
    %36 = vector.load %arg4[%c6, %c0_24, %c0_25] : memref<9x8x4xbf16, #tpu.memory_space<vmem>>, vector<1x8x4xbf16>
    %37 = vector.shape_cast %36 : vector<1x8x4xbf16> to vector<8x4xbf16>
    %38 = vector.extract_strided_slice %4 {offsets = [0, 36], sizes = [4, 384], strides = [1, 1]} : vector<4x768xbf16> to vector<4x384xbf16>
    %cst_26 = arith.constant dense<0.000000e+00> : vector<8x384xf32>
    %39 = tpu.matmul %37, %38, %cst_26 {dimension_numbers = #tpu.dot_dimension_numbers<[1], [0], [0], [1], [0, 0, 1, 1], [], []>} : vector<8x4xbf16>, vector<4x384xbf16>, vector<8x384xf32> -> vector<8x384xf32>
    %40 = arith.addf %35, %39 : vector<8x384xf32>
    %c7 = arith.constant 7 : index
    %c0_27 = arith.constant 0 : index
    %c0_28 = arith.constant 0 : index
    %41 = vector.load %arg4[%c7, %c0_27, %c0_28] : memref<9x8x4xbf16, #tpu.memory_space<vmem>>, vector<1x8x4xbf16>
    %42 = vector.shape_cast %41 : vector<1x8x4xbf16> to vector<8x4xbf16>
    %43 = vector.extract_strided_slice %4 {offsets = [0, 37], sizes = [4, 384], strides = [1, 1]} : vector<4x768xbf16> to vector<4x384xbf16>
    %cst_29 = arith.constant dense<0.000000e+00> : vector<8x384xf32>
    %44 = tpu.matmul %42, %43, %cst_29 {dimension_numbers = #tpu.dot_dimension_numbers<[1], [0], [0], [1], [0, 0, 1, 1], [], []>} : vector<8x4xbf16>, vector<4x384xbf16>, vector<8x384xf32> -> vector<8x384xf32>
    %45 = arith.addf %40, %44 : vector<8x384xf32>
    %c8 = arith.constant 8 : index
    %c0_30 = arith.constant 0 : index
    %c0_31 = arith.constant 0 : index
    %46 = vector.load %arg4[%c8, %c0_30, %c0_31] : memref<9x8x4xbf16, #tpu.memory_space<vmem>>, vector<1x8x4xbf16>
    %47 = vector.shape_cast %46 : vector<1x8x4xbf16> to vector<8x4xbf16>
    %48 = vector.extract_strided_slice %4 {offsets = [0, 38], sizes = [4, 384], strides = [1, 1]} : vector<4x768xbf16> to vector<4x384xbf16>
    %cst_32 = arith.constant dense<0.000000e+00> : vector<8x384xf32>
    %49 = tpu.matmul %47, %48, %cst_32 {dimension_numbers = #tpu.dot_dimension_numbers<[1], [0], [0], [1], [0, 0, 1, 1], [], []>} : vector<8x4xbf16>, vector<4x384xbf16>, vector<8x384xf32> -> vector<8x384xf32>
    %50 = arith.addf %45, %49 : vector<8x384xf32>
    %c0_33 = arith.constant 0 : index
    %c0_34 = arith.constant 0 : index
    %51 = vector.load %arg5[%c0_33, %c0_34] : memref<8x1xf32, #tpu.memory_space<vmem>>, vector<8x1xf32>
    %52 = vector.broadcast %51 : vector<8x1xf32> to vector<8x384xf32>
    %53 = arith.addf %50, %52 : vector<8x384xf32>
    %cst_35 = arith.constant 0.000000e+00 : f32
    %54 = vector.broadcast %cst_35 : f32 to vector<8x384xf32>
    %55 = arith.maximumf %53, %54 : vector<8x384xf32>
    %cst_36 = arith.constant 0.000000e+00 : f32
    %56 = vector.broadcast %cst_36 : f32 to vector<8x384xf32>
    %57 = arith.subf %56, %55 : vector<8x384xf32>
    %58 = math.exp %57 : vector<8x384xf32>
    %cst_37 = arith.constant 1.000000e+00 : f32
    %59 = vector.broadcast %cst_37 : f32 to vector<8x384xf32>
    %60 = arith.addf %59, %58 : vector<8x384xf32>
    %61 = tpu.reciprocal %60 {approx = true} : vector<8x384xf32> -> vector<8x384xf32>
    %c0_38 = arith.constant 0 : index
    %c0_39 = arith.constant 0 : index
    %c0_40 = arith.constant 0 : index
    %62 = vector.load %arg6[%c0_38, %c0_39, %c0_40] : memref<1x8x384xf32, #tpu.memory_space<vmem>>, vector<1x8x384xf32>
    %63 = vector.shape_cast %62 : vector<1x8x384xf32> to vector<8x384xf32>
    %64 = vector.shape_cast %61 : vector<8x384xf32> to vector<1x8x384xf32>
    tpu.vector_store %arg6[%c0_38, %c0_39, %c0_40], %64 {strides = array<i32>} : memref<1x8x384xf32, #tpu.memory_space<vmem>>, vector<1x8x384xf32>,
    return
  }
  func.func @transform_0(%arg0: i32, %arg1: i32) -> (i32, i32, i32) {
    %c0_i32 = arith.constant 0 : i32
    %c0_i32_0 = arith.constant 0 : i32
    return %arg0, %c0_i32, %arg1 : i32, i32, i32
  }
  func.func @transform_1(%arg0: i32, %arg1: i32) -> (i32, i32, i32) {
    %c1_i32 = arith.constant 1 : i32
    %0 = arith.addi %arg1, %c1_i32 : i32
    %c0_i32 = arith.constant 0 : i32
    %c0_i32_0 = arith.constant 0 : i32
    return %arg0, %c0_i32, %0 : i32, i32, i32
  }
  func.func @transform_2(%arg0: i32, %arg1: i32) -> (i32, i32, i32) {
    %c0_i32 = arith.constant 0 : i32
    %c0_i32_0 = arith.constant 0 : i32
    %c0_i32_1 = arith.constant 0 : i32
    %c0_i32_2 = arith.constant 0 : i32
    return %c0_i32, %c0_i32_0, %c0_i32_1 : i32, i32, i32
  }
  func.func @transform_3(%arg0: i32, %arg1: i32) -> (i32, i32) {
    %c0_i32 = arith.constant 0 : i32
    %c0_i32_0 = arith.constant 0 : i32
    %c0_i32_1 = arith.constant 0 : i32
    return %c0_i32, %c0_i32_0 : i32, i32
  }
  func.func @transform_4(%arg0: i32, %arg1: i32) -> (i32, i32, i32) {
    %c0_i32 = arith.constant 0 : i32
    %c0_i32_0 = arith.constant 0 : i32
    return %arg0, %c0_i32, %arg1 : i32, i32, i32
  }
}

</mosaic_0001>

<bundles_post_ra>
// kernel: tpu_custom_call.1
= control target key start
LH: loop header
LB: loop body
LE: loop exit
PB: predicated region body
PF: predicated region fallthrough
CT: control target
= control target key end

     0   :  { %9 = vsyncpa [#allocation3], 0  ;;  %s1477_s0 = inlined_call_operand.vmem [shape: bf16[2,4,768], index: 0, kind: input, shape index: {}]   ;;  %s1478_s1 = inlined_call_operand.vmem [shape: bf16[2,4,768], index: 1, kind: input, shape index: {}]   ;;  %s1479_s2 = inlined_call_operand.vmem [shape: bf16[9,8,4], index: 2, kind: input, shape index: {}]   ;;  %s1480_s3 = inlined_call_operand.vmem [shape: f32[8,1], index: 3, kind: input, shape index: {}]   ;;  %s1481_s4 = inlined_call_operand.hbm [shape: f32[2,8,384], index: 4, kind: output, shape index: {}]  }
   0x1   :  { %11 = vsyncpa [#allocation3 + $0x1], 0  ;;  %s1264_s15 = smov 0   ;;  %s1266_s16 = smov 0  }
   0x2   :  { %s1268_s17 = smov 0   ;;  %s1270_s18 = smov 0  }
   0x3   :  { %s1272_s19 = smov 0   ;;  %s1274_s20 = smov 0  }
   0x4 LB: > { %s1020_s21 = sadd.s32 4294967295, %s1228_s20   ;;  %s1021_s22 = sadd.s32 4294967294, %s1228_s20   ;;  %s1228_s20 = sphi %s1274_s20, %s17_s20   ;;  %s1224_s19 = sphi %s1272_s19, %s1488_s19   ;;  %s1220_s18 = sphi %s1270_s18, %s1487_s18   ;;  %s1216_s17 = sphi %s1268_s17, %s1486_s17   ;;  %s1212_s16 = sphi %s1266_s16, %s1485_s16   ;;  %s1208_s15 = sphi %s1264_s15, %s1484_s15  }
   0x5   : > { %s29_s23 = sadd.s32 1, %s1224_s19  ;;  %s138_s24 = sadd.s32 1, %s1216_s17 }
   0x6   : > { %p31_p0 = scmp.ge.s32.totalorder %s29_s23, 2  ;;  %p148_p1 = scmp.ne.s32.totalorder %s1216_s17, %s1212_s16 }
   0x7   : > { %p149_p2 = scmp.eq.s32.totalorder %s1020_s21, 1  ;;  %p154_p3 = scmp.ne.s32.totalorder %s1212_s16, %s1208_s15 }
   0x8   : > { %s1490_s23 = smov (%p31_p0, %s29_s23), 0  ;;  %p155_p5 = scmp.eq.s32.totalorder %s1021_s22, 1 }
   0x9   : > { %p1304_p4 = por %p149_p2, %p148_p1  ;;  %s133_s26 = ssub.s32 %s1224_s19, %s1490_s23 }
   0xa   : > { %p1024_p6 = scmp.ge.s32.totalorder %s1228_s20, 1  ;;  %p136_p7 = scmp.eq.s32.totalorder %s133_s26, 0 }
   0xb   : > { %p1311_p8 = por %p155_p5, %p154_p3  ;;  %p207_p9 = scmp.lt.s32.totalorder %s1228_s20, 3 }
   0xc   : > { %s1317_s28 = scalar_select %p136_p7, %s1216_s17, %s138_s24  }
   0xd   : > { %p208_p10 = pnand %p1024_p6, %p207_p9 }
   0xe   : > { %p248_p11 = scmp.lt.s32.totalorder (!%p208_p10), %s1220_s18, 1  ;;  %s1230_s12 = smov (!%p208_p10), 127  }
   0xf   : > { %211 = sbr.rel (%p208_p10) target bundleno = 422 (0x1a6), region = 36  ;;  %s1231_s13 = smov (!%p208_p10), 126  }
  0x10   : > { %s1232_s14 = smov (!%p208_p10), 110   ;;  %s1233_s21 = smov (!%p208_p10), 109  }
  0x11   : > { %s1234_s22 = smov (!%p208_p10), 108   ;;  %s1235_s24 = smov (!%p208_p10), 92  }
  0x12   : > { %s1236_s26 = smov (!%p208_p10), 91   ;;  %s1070_s10 = smul.u32 (!%p208_p10), 24, %s1220_s18 }
  0x13   : > { %s1170_s5 = scalar_lea.hbm (!%p208_p10), %s1481_s4, 48 }
  0x14   : > { %s249_s29 = scalar_select %p248_p11, %s1220_s18, 1  ;;  %vm304_vm0 = vcmask 1041408   ;;  %v285_v7 = vld [vmem:[%s1479_s2] sm:$0xf]  ;;  %vm300_vm1 = vcmask 31744   ;;  %vm411_vm2 = vcmask 1031168  }
  0x15   : > { %vm296_vm3 = vcmask 1039360   ;;  %v1027_v26 = vld [vmem:[%s1479_s2 + $0x4] sm:$0xf]  ;;  %vm479_vm4 = vcmask 900096   ;;  %v1034_v36 = vld [vmem:[%s1479_s2 + $0x8] sm:$0xf] }
  0x16   : > { %s1068_s30 = smul.u32 12, %s249_s29  ;;  %s1237_s29 = smov 90   ;;  %vm547_vm5 = vcmask 891904   ;;  %v1038_v49 = vld [vmem:[%s1479_s2 + $0xc] sm:$0xf]  ;;  %vm615_vm6 = vcmask 883712  }
  0x17   : > { %vm683_vm7 = vcmask 752640   ;;  %vm751_vm8 = vcmask 744448   ;;  %vm819_vm9 = vcmask 736256  }
  0x18   : > { %s255_s7 = scalar_lea.vmem %s1477_s0, %s1068_s30  ;;  %s1066_s8 = sadd.s32 6, %s1068_s30 }
  0x19   : > { %v271_v0 = vld [vmem:[%s255_s7] sm:$0x3f]  ;;  %s266_s11 = scalar_lea.vmem %s1478_s1, %s1066_s8  ;;  %s244_s8 = sand.u32 1, %s1212_s16  }
  0x1a   : > { %274 = vst [vmem:[#allocation1] ss:$4 sm:$0xff] %v271_v0  ;;  %v272_v1 = vld [vmem:[%s266_s11] sm:$0x3f]  ;;  %s1067_s9 = smul.u32 24, %s244_s8  ;;  %s908_s18 = scalar_lea.sflag [#allocation3], %s244_s8 }
  0x21   : > { %v1327_v2 = vld.sshfl [vmem:[#allocation1 + $0x10] sm:$0xff pattern:$0x73625140]  ;;  %v275_v3 = vld.sshfl [vmem:[#allocation1] sm:$0xff pattern:$0x73625140] }
  0x22   : > { %292 = vrot.lane.b32.xlu0 %v1327_v2, %s1230_s12  ;;  %288 = vrot.lane.b32.xlu1 %v275_v3, %s1230_s12  ;;  %v277_v4 = vld.sshfl [vmem:[#allocation1 + $0x8] sm:$0xff pattern:$0x73625140]  ;;  %v356_v6 = vsel %vm304_vm0, %v275_v3, 0  ;;  %v360_v24 = vsel %vm304_vm0, %v1327_v2, 0 }
  0x23   : > { %282 = vst [vmem:[#allocation1] ss:$4 sm:$0xff] %v272_v1  ;;  %403 = vrot.lane.b32.xlu2 %v275_v3, %s1231_s13  ;;  %369 = vmatpush.bf16.msra.mxu3 %v356_v6  ;;  %v358_v20 = vsel %vm304_vm0, %v277_v4, 0  ;;  %v1046_v1 = vld [vmem:[%s1479_s2 + $0x14] sm:$0xf] }
  0x26   : > { %1031 = vmatmul.msk.bf16.vlgmr.msra.gmra.mxu3 %vm300_vm1, %v285_v7 }
  0x2a   : > { %290 = vrot.lane.b32.xlu1 %v277_v4, %s1230_s12  ;;  %v283_v5 = vld.sshfl [vmem:[#allocation1] sm:$0xff pattern:$0x73625140] }
  0x2b   : > { %294 = vrot.lane.b32.xlu0 %v283_v5, %s1230_s12  ;;  %405 = vrot.lane.b32.xlu2 %v277_v4, %s1231_s13 }
  0x32   : > { %473 = vrot.lane.b32.xlu1 %v277_v4, %s1232_s14 }
  0x33   : > { %407 = vrot.lane.b32.xlu0 %v1327_v2, %s1231_s13  ;;  %475 = vrot.lane.b32.xlu2 %v1327_v2, %s1232_s14 }
  0x3a   : > { %471 = vrot.lane.b32.xlu1 %v275_v3, %s1232_s14 }
  0x3b   : > { %409 = vrot.lane.b32.xlu0 %v283_v5, %s1231_s13  ;;  %477 = vrot.lane.b32.xlu2 %v283_v5, %s1232_s14  ;;  %s921_s13 = scalar_lea.hbm %s1481_s4, %s1070_s10  ;;  %s246_s14 = scalar_lea.vmem [#allocation2], %s1067_s9 }
  0x42   : > { %545 = vrot.lane.b32.xlu1 %v283_v5, %s1233_s21 }
  0x43   : > { %543 = vrot.lane.b32.xlu0 %v1327_v2, %s1233_s21  ;;  %539 = vrot.lane.b32.xlu2 %v275_v3, %s1233_s21 }
  0x4a   : > { %607 = vrot.lane.b32.xlu1 %v275_v3, %s1234_s22 }
  0x4b   : > { %541 = vrot.lane.b32.xlu0 %v277_v4, %s1233_s21  ;;  %609 = vrot.lane.b32.xlu2 %v277_v4, %s1234_s22  ;;  %s923_s21 = sshll.u32 %s246_s14, 4  ;;  %s924_s21 = int_to_ptr.vmem [resolvable:$true] %s923_s21 }
  0x52   : > { %677 = vrot.lane.b32.xlu1 %v277_v4, %s1235_s24 }
  0x53   : > { %675 = vrot.lane.b32.xlu0 %v275_v3, %s1235_s24  ;;  %611 = vrot.lane.b32.xlu2 %v1327_v2, %s1234_s22 }
  0x5a   : > { %679 = vrot.lane.b32.xlu1 %v1327_v2, %s1235_s24 }
  0x5b   : > { %613 = vrot.lane.b32.xlu0 %v283_v5, %s1234_s22  ;;  %745 = vrot.lane.b32.xlu2 %v277_v4, %s1236_s26  ;;  %s925_s22 = sshll.u32 %s921_s13, 4  ;;  %s926_s22 = int_to_ptr.hbm [resolvable:$true] %s925_s22 }
  0x62   : > { %681 = vrot.lane.b32.xlu1 %v283_v5, %s1235_s24  ;;  %s1164_s24 = sshra.s32 %s926_s22, 4  ;;  %s1165_s24 = int_to_ptr.hbm [resolvable:$true] %s1164_s24 }
  0x63   : > { %747 = vrot.lane.b32.xlu0 %v1327_v2, %s1236_s26  ;;  %743 = vrot.lane.b32.xlu2 %v275_v3, %s1236_s26  ;;  %p1171_p1 = scmp.lt.s32.totalorder %s1165_s24, %s1481_s4 }
  0x6a   : > { %815 = vrot.lane.b32.xlu1 %v1327_v2, %s1237_s29 }
  0x6b   : > { %749 = vrot.lane.b32.xlu0 %v283_v5, %s1236_s26  ;;  %817 = vrot.lane.b32.xlu2 %v283_v5, %s1237_s29  ;;  %s1166_s26 = scalar_lea.hbm %s1165_s24, 24 }
  0x6c   : > { %p1167_p12 = scmp.ne.s32.totalorder %s1165_s24, %s1166_s26  ;;  %p1172_p2 = scmp.lt.s32.totalorder %s1170_s5, %s1166_s26 }
  0x6e   : > { %p1168_p13 = pnand %p1167_p12, %p1304_p4  ;;  %p1173_p3 = por %p1172_p2, %p1171_p1 }
  0x70   : > { %p1169_p0 = pneg %p1168_p13 }
  0x72   : > { %813 = vrot.lane.b32.xlu1 %v277_v4, %s1237_s29  ;;  %p1174_p5 = pnand %p1173_p3, %p1169_p0 }
  0x73   : > { %811 = vrot.lane.b32.xlu0 %v275_v3, %s1237_s29 }
  0x7d   : > { %v404_v8 = vpop.permute.xlu2 %403 }
  0x85   : > { %v406_v9 = vpop.permute.xlu2 %405 }
  0x86   : > { %v412_v13 = vsel %vm411_vm2, %v404_v8, %v406_v9 }
  0x87   : > { %v419_v19 = vsel %vm304_vm0, %v412_v13, 0 }
  0x8d   : > { %v476_v10 = vpop.permute.xlu2 %475 }
  0x94   : > { %v293_v11 = vpop.permute.xlu0 %292  ;;  %v289_v12 = vpop.permute.xlu1 %288 }
  0x95   : > { %v478_v14 = vpop.permute.xlu2 %477 }
  0x96   : > { %v482_v27 = vsel %vm479_vm4, %v476_v10, %v478_v14 }
  0x97   : > { %v493_v34 = vsel %vm304_vm0, %v482_v27, 0 }
  0x9c   : > { %v291_v15 = vpop.permute.xlu1 %290 }
  0x9d   : > { %v295_v16 = vpop.permute.xlu0 %294  ;;  %v297_v17 = vsel %vm296_vm3, %v289_v12, %v291_v15  ;;  %v298_v18 = vsel %vm296_vm3, %v291_v15, %v293_v11  ;;  %v540_v29 = vpop.permute.xlu2 %539 }
  0x9e   : > { %v306_v21 = vsel %vm304_vm0, %v297_v17, 0  ;;  %v309_v22 = vsel %vm304_vm0, %v298_v18, 0  ;;  %v299_v23 = vsel %vm296_vm3, %v293_v11, %v295_v16  ;;  %v1050_v18 = vld [vmem:[%s1479_s2 + $0x18] sm:$0xf] }
  0x9f   : > { %321 = vmatpush.bf16.msra.mxu0 %v306_v21  ;;  %334 = vmatpush.bf16.msra.mxu1 %v309_v22  ;;  %v312_v25 = vsel %vm304_vm0, %v299_v23, 0 }
  0xa0   : > { %347 = vmatpush.bf16.msra.mxu2 %v312_v25 }
  0xa2   : > { %1028 = vmatmul.msk.bf16.vlgmr.msra.gmra.mxu0 %vm300_vm1, %v1027_v26  ;;  %1029 = vmatmul.msk.bf16.vlgmr.msra.gmra.mxu1 %vm300_vm1, %v1027_v26 }
  0xa3   : > { %382 = vmatpush.bf16.msrb.mxu0 %v358_v20  ;;  %395 = vmatpush.bf16.msrb.mxu1 %v360_v24 }
  0xa4   : > { %434 = vmatpush.bf16.msrb.mxu2 %v419_v19  ;;  %v474_v28 = vpop.permute.xlu1 %473 }
  0xa5   : > { %1030 = vmatmul.msk.bf16.vlgmr.msra.gmra.mxu2 %vm300_vm1, %v1027_v26  ;;  %v408_v30 = vpop.permute.xlu0 %407  ;;  %v481_v31 = vsel %vm479_vm4, %v474_v28, %v476_v10  ;;  %v610_v42 = vpop.permute.xlu2 %609  ;;  %v1042_v10 = vld [vmem:[%s1479_s2 + $0x10] sm:$0xf] }
  0xa6   : > { %v490_v32 = vsel %vm304_vm0, %v481_v31, 0  ;;  %v413_v33 = vsel %vm411_vm2, %v406_v9, %v408_v30 }
  0xa7   : > { %v422_v35 = vsel %vm304_vm0, %v413_v33, 0  ;;  %v1058_v33 = vld [vmem:[%s1479_s2 + $0x20] sm:$0xf] }
  0xa8   : > { %515 = vmatpush.bf16.msra.mxu2 %v490_v32  ;;  %447 = vmatpush.bf16.msrb.mxu3 %v422_v35  ;;  %v1054_v32 = vld [vmem:[%s1479_s2 + $0x1c] sm:$0xf]  ;;  %v1238_v35 = vmov 0  }
  0xa9   : > { %1136 = vset.pattern.permute.xlu2 %v1238_v35  ;;  %1137 = vset.pattern.permute.xlu0 %v1238_v35 }
  0xab   : > { %1036 = vmatmul.msk.bf16.vlgmr.msrb.gmra.mxu3 %vm300_vm1, %v1034_v36 }
  0xac   : > { %528 = vmatpush.bf16.msra.mxu3 %v493_v34  ;;  %v472_v37 = vpop.permute.xlu1 %471  ;;  %v371_v34 = vpop.f32.mrf.mxu3 }
  0xad   : > { %v480_v38 = vsel %vm479_vm4, %v472_v37, %v474_v28  ;;  %v410_v39 = vpop.permute.xlu0 %409  ;;  %v612_v47 = vpop.permute.xlu2 %611 }
  0xae   : > { %v487_v40 = vsel %vm304_vm0, %v480_v38, 0  ;;  %v414_v41 = vsel %vm411_vm2, %v408_v30, %v410_v39  ;;  %v617_v53 = vsel %vm615_vm6, %v610_v42, %v612_v47 }
  0xaf   : > { %v425_v43 = vsel %vm304_vm0, %v414_v41, 0  ;;  %502 = vmatpush.bf16.msra.mxu1 %v487_v40  ;;  %v626_v59 = vsel %vm304_vm0, %v617_v53, 0 }
  0xb0   : > { %460 = vmatpush.bf16.msra.mxu0 %v425_v43 }
  0xb2   : > { %1032 = vmatmul.msk.bf16.vlgmr.msrb.gmra.mxu0 %vm300_vm1, %v285_v7  ;;  %1033 = vmatmul.msk.bf16.vlgmr.msrb.gmra.mxu1 %vm300_vm1, %v285_v7 }
  0xb4   : > { %v546_v44 = vpop.permute.xlu1 %545  ;;  %v373_v37 = vpop.f32.mrf.mxu3 }
  0xb5   : > { %1035 = vmatmul.msk.bf16.vlgmr.msrb.gmra.mxu2 %vm300_vm1, %v1034_v36  ;;  %v544_v45 = vpop.permute.xlu0 %543  ;;  %v746_v60 = vpop.permute.xlu2 %745 }
  0xb6   : > { %v550_v46 = vsel %vm547_vm5, %v544_v45, %v546_v44 }
  0xb7   : > { %v561_v48 = vsel %vm304_vm0, %v550_v46, 0 }
  0xb8   : > { %596 = vmatpush.bf16.msrb.mxu2 %v561_v48 }
  0xbb   : > { %1041 = vmatmul.msk.bf16.vlgmr.msra.gmra.mxu3 %vm300_vm1, %v1038_v49 }
  0xbc   : > { %v608_v50 = vpop.permute.xlu1 %607 }
  0xbd   : > { %v542_v51 = vpop.permute.xlu0 %541  ;;  %v616_v52 = vsel %vm615_vm6, %v608_v50, %v610_v42  ;;  %v744_v2 = vpop.permute.xlu2 %743 }
  0xbe   : > { %v548_v54 = vsel %vm547_vm5, %v540_v29, %v542_v51  ;;  %v549_v55 = vsel %vm547_vm5, %v542_v51, %v544_v45  ;;  %v623_v56 = vsel %vm304_vm0, %v616_v52, 0  ;;  %v752_v6 = vsel %vm751_vm8, %v744_v2, %v746_v60 }
  0xbf   : > { %v555_v57 = vsel %vm304_vm0, %v548_v54, 0  ;;  %v558_v58 = vsel %vm304_vm0, %v549_v55, 0  ;;  %638 = vmatpush.bf16.msrb.mxu3 %v623_v56  ;;  %v759_v11 = vsel %vm304_vm0, %v752_v6, 0 }
  0xc0   : > { %583 = vmatpush.bf16.msrb.mxu1 %v558_v58  ;;  %570 = vmatpush.bf16.msrb.mxu0 %v555_v57 }
  0xc2   : > { %1037 = vmatmul.msk.bf16.vlgmr.msra.gmra.mxu0 %vm300_vm1, %v1034_v36  ;;  %1039 = vmatmul.msk.bf16.vlgmr.msra.gmra.mxu1 %vm300_vm1, %v1038_v49  ;;  %v877_v36 = vld [vmem:[%s1480_s3] sm:$0xff] }
  0xc3   : > { %880 = vperm.xlu2 %1136, %v877_v36  }
  0xc4   : > { %651 = vmatpush.bf16.msra.mxu0 %v626_v59  ;;  %v678_v61 = vpop.permute.xlu1 %677 }
  0xc5   : > { %1040 = vmatmul.msk.bf16.vlgmr.msra.gmra.mxu2 %vm300_vm1, %v1038_v49  ;;  %v676_v62 = vpop.permute.xlu0 %675  ;;  %v818_v19 = vpop.permute.xlu2 %817 }
  0xc6   : > { %v684_v63 = vsel %vm683_vm7, %v676_v62, %v678_v61 }
  0xc7   : > { %v691_v0 = vsel %vm304_vm0, %v684_v63, 0 }
  0xc8   : > { %706 = vmatpush.bf16.msra.mxu2 %v691_v0 }
  0xcb   : > { %1047 = vmatmul.msk.bf16.vlgmr.msrb.gmra.mxu3 %vm300_vm1, %v1046_v1 }
  0xcc   : > { %v680_v3 = vpop.permute.xlu1 %679 }
  0xcd   : > { %v685_v4 = vsel %vm683_vm7, %v678_v61, %v680_v3  ;;  %v614_v5 = vpop.permute.xlu0 %613 }
  0xce   : > { %v694_v7 = vsel %vm304_vm0, %v685_v4, 0  ;;  %v618_v8 = vsel %vm615_vm6, %v612_v47, %v614_v5 }
  0xcf   : > { %v629_v9 = vsel %vm304_vm0, %v618_v8, 0  ;;  %719 = vmatpush.bf16.msra.mxu3 %v694_v7 }
  0xd0   : > { %664 = vmatpush.bf16.msra.mxu1 %v629_v9 }
  0xd2   : > { %1043 = vmatmul.msk.bf16.vlgmr.msrb.gmra.mxu0 %vm300_vm1, %v1042_v10  ;;  %1044 = vmatmul.msk.bf16.vlgmr.msrb.gmra.mxu1 %vm300_vm1, %v1042_v10 }
  0xd4   : > { %774 = vmatpush.bf16.msrb.mxu1 %v759_v11  ;;  %v682_v12 = vpop.permute.xlu1 %681 }
  0xd5   : > { %1045 = vmatmul.msk.bf16.vlgmr.msrb.gmra.mxu2 %vm300_vm1, %v1042_v10  ;;  %v748_v13 = vpop.permute.xlu0 %747  ;;  %v686_v14 = vsel %vm683_vm7, %v680_v3, %v682_v12 }
  0xd6   : > { %v753_v15 = vsel %vm751_vm8, %v746_v60, %v748_v13  ;;  %v697_v16 = vsel %vm304_vm0, %v686_v14, 0 }
  0xd7   : > { %v762_v17 = vsel %vm304_vm0, %v753_v15, 0  ;;  %732 = vmatpush.bf16.msrb.mxu0 %v697_v16 }
  0xd8   : > { %787 = vmatpush.bf16.msrb.mxu2 %v762_v17 }
  0xdb   : > { %1052 = vmatmul.msk.bf16.vlgmr.msra.gmra.mxu3 %vm300_vm1, %v1050_v18 }
  0xdc   : > { %v816_v20 = vpop.permute.xlu1 %815 }
  0xdd   : > { %v750_v21 = vpop.permute.xlu0 %749  ;;  %v822_v23 = vsel %vm819_vm9, %v816_v20, %v818_v19 }
  0xde   : > { %v754_v22 = vsel %vm751_vm8, %v748_v13, %v750_v21  ;;  %v833_v25 = vsel %vm304_vm0, %v822_v23, 0 }
  0xdf   : > { %v765_v24 = vsel %vm304_vm0, %v754_v22, 0 }
  0xe0   : > { %800 = vmatpush.bf16.msrb.mxu3 %v765_v24 }
  0xe2   : > { %1048 = vmatmul.msk.bf16.vlgmr.msra.gmra.mxu0 %vm300_vm1, %v1046_v1  ;;  %1049 = vmatmul.msk.bf16.vlgmr.msra.gmra.mxu1 %vm300_vm1, %v1046_v1 }
  0xe4   : > { %v814_v26 = vpop.permute.xlu1 %813 }
  0xe5   : > { %1051 = vmatmul.msk.bf16.vlgmr.msra.gmra.mxu2 %vm300_vm1, %v1050_v18  ;;  %v821_v27 = vsel %vm819_vm9, %v814_v26, %v816_v20  ;;  %v812_v28 = vpop.permute.xlu0 %811 }
  0xe6   : > { %868 = vmatpush.bf16.msra.mxu2 %v833_v25  ;;  %v830_v29 = vsel %vm304_vm0, %v821_v27, 0  ;;  %v820_v30 = vsel %vm819_vm9, %v812_v28, %v814_v26 }
  0xe7   : > { %855 = vmatpush.bf16.msra.mxu1 %v830_v29  ;;  %v827_v31 = vsel %vm304_vm0, %v820_v30, 0 }
  0xe8   : > { %842 = vmatpush.bf16.msra.mxu0 %v827_v31 }
  0xeb   : > { %1057 = vmatmul.msk.bf16.vlgmr.msrb.gmra.mxu3 %vm300_vm1, %v1054_v32 }
  0xf2   : > { %1053 = vmatmul.msk.bf16.vlgmr.msrb.gmra.mxu0 %vm300_vm1, %v1050_v18  ;;  %1055 = vmatmul.msk.bf16.vlgmr.msrb.gmra.mxu1 %vm300_vm1, %v1054_v32 }
  0xf5   : > { %1056 = vmatmul.msk.bf16.vlgmr.msrb.gmra.mxu2 %vm300_vm1, %v1054_v32 }
 0x102   : > { %1059 = vmatmul.msk.bf16.vlgmr.msra.gmra.mxu0 %vm300_vm1, %v1058_v33  ;;  %1060 = vmatmul.msk.bf16.vlgmr.msra.gmra.mxu1 %vm300_vm1, %v1058_v33 }
 0x105   : > { %1061 = vmatmul.msk.bf16.vlgmr.msra.gmra.mxu2 %vm300_vm1, %v1058_v33 }
 0x11f   : > { %v323_v38 = vpop.f32.mrf.mxu0  ;;  %v336_v39 = vpop.f32.mrf.mxu1 }
 0x120   : > { %v372_v40 = vadd.f32 %v371_v34, %v323_v38  ;;  %v881_v38 = vpop.permute.xlu2 %880 }
 0x127   : > { %v325_v42 = vpop.f32.mrf.mxu0  ;;  %v338_v43 = vpop.f32.mrf.mxu1 }
 0x128   : > { %v349_v41 = vpop.f32.mrf.mxu2 }
 0x12e   : > { %v449_v45 = vpop.f32.mrf.mxu3 }
 0x12f   : > { %v384_v46 = vpop.f32.mrf.mxu0  ;;  %v397_v47 = vpop.f32.mrf.mxu1 }
 0x130   : > { %v351_v44 = vpop.f32.mrf.mxu2  ;;  %v385_v48 = vadd.f32 %v384_v46, %v336_v39  ;;  %v398_v49 = vadd.f32 %v397_v47, %v349_v41 }
 0x132   : > { %v467_v50 = vadd.f32 %v449_v45, %v385_v48 }
 0x136   : > { %v451_v52 = vpop.f32.mrf.mxu3 }
 0x137   : > { %v386_v53 = vpop.f32.mrf.mxu0  ;;  %v399_v54 = vpop.f32.mrf.mxu1 }
 0x138   : > { %v436_v51 = vpop.f32.mrf.mxu2 }
 0x139   : > { %v466_v19 = vadd.f32 %v436_v51, %v372_v40 }
 0x13e   : > { %v530_v56 = vpop.f32.mrf.mxu3 }
 0x13f   : > { %v462_v57 = vpop.f32.mrf.mxu0  ;;  %v504_v58 = vpop.f32.mrf.mxu1 }
 0x140   : > { %v438_v55 = vpop.f32.mrf.mxu2  ;;  %v534_v20 = vadd.f32 %v504_v58, %v466_v19  ;;  %v468_v26 = vadd.f32 %v462_v57, %v398_v49 }
 0x142   : > { %v536_v31 = vadd.f32 %v530_v56, %v468_v26 }
 0x146   : > { %v532_v60 = vpop.f32.mrf.mxu3 }
 0x147   : > { %v464_v61 = vpop.f32.mrf.mxu0  ;;  %v506_v62 = vpop.f32.mrf.mxu1 }
 0x148   : > { %v517_v59 = vpop.f32.mrf.mxu2 }
 0x149   : > { %v535_v21 = vadd.f32 %v517_v59, %v467_v50 }
 0x14e   : > { %v640_v0 = vpop.f32.mrf.mxu3 }
 0x14f   : > { %v572_v1 = vpop.f32.mrf.mxu0  ;;  %v585_v2 = vpop.f32.mrf.mxu1 }
 0x150   : > { %v519_v63 = vpop.f32.mrf.mxu2  ;;  %v602_v22 = vadd.f32 %v572_v1, %v534_v20  ;;  %v603_v23 = vadd.f32 %v585_v2, %v535_v21 }
 0x152   : > { %v670_v30 = vadd.f32 %v640_v0, %v602_v22 }
 0x156   : > { %v642_v4 = vpop.f32.mrf.mxu3 }
 0x157   : > { %v574_v5 = vpop.f32.mrf.mxu0  ;;  %v587_v6 = vpop.f32.mrf.mxu1 }
 0x158   : > { %v598_v3 = vpop.f32.mrf.mxu2 }
 0x159   : > { %v604_v34 = vadd.f32 %v598_v3, %v536_v31 }
 0x15e   : > { %v721_v8 = vpop.f32.mrf.mxu3 }
 0x15f   : > { %v653_v9 = vpop.f32.mrf.mxu0  ;;  %v666_v10 = vpop.f32.mrf.mxu1 }
 0x160   : > { %v600_v7 = vpop.f32.mrf.mxu2  ;;  %v671_v29 = vadd.f32 %v653_v9, %v603_v23  ;;  %v672_v39 = vadd.f32 %v666_v10, %v604_v34 }
 0x162   : > { %v739_v32 = vadd.f32 %v721_v8, %v671_v29 }
 0x166   : > { %v723_v12 = vpop.f32.mrf.mxu3 }
 0x167   : > { %v655_v13 = vpop.f32.mrf.mxu0  ;;  %v668_v14 = vpop.f32.mrf.mxu1 }
 0x168   : > { %v708_v11 = vpop.f32.mrf.mxu2 }
 0x169   : > { %v738_v33 = vadd.f32 %v708_v11, %v670_v30 }
 0x16e   : > { %v802_v16 = vpop.f32.mrf.mxu3 }
 0x16f   : > { %v734_v17 = vpop.f32.mrf.mxu0  ;;  %v776_v18 = vpop.f32.mrf.mxu1 }
 0x170   : > { %v710_v15 = vpop.f32.mrf.mxu2  ;;  %v806_v35 = vadd.f32 %v776_v18, %v738_v33  ;;  %v740_v44 = vadd.f32 %v734_v17, %v672_v39 }
 0x172   : > { %v808_v49 = vadd.f32 %v802_v16, %v740_v44 }
 0x176   : > { %v804_v25 = vpop.f32.mrf.mxu3 }
 0x177   : > { %v736_v27 = vpop.f32.mrf.mxu0  ;;  %v778_v28 = vpop.f32.mrf.mxu1 }
 0x178   : > { %v789_v24 = vpop.f32.mrf.mxu2 }
 0x179   : > { %v807_v36 = vadd.f32 %v789_v24, %v739_v32 }
 0x17f   : > { %v844_v40 = vpop.f32.mrf.mxu0  ;;  %v857_v41 = vpop.f32.mrf.mxu1 }
 0x180   : > { %v791_v37 = vpop.f32.mrf.mxu2  ;;  %v874_v42 = vadd.f32 %v844_v40, %v806_v35  ;;  %v875_v43 = vadd.f32 %v857_v41, %v807_v36 }
 0x182   : > { %v883_v45 = vadd.f32 %v881_v38, %v874_v42  ;;  %v884_v46 = vadd.f32 %v881_v38, %v875_v43 }
 0x184   : > { %v886_v47 = vmax.f32 %v883_v45, 0.0  ;;  %v887_v48 = vmax.f32 %v884_v46, 0.0 }
 0x186   : > { %v889_v50 = vsub.f32 0.0, %v886_v47  ;;  %v890_v51 = vsub.f32 0.0, %v887_v48 }
 0x187   : > { %v846_v54 = vpop.f32.mrf.mxu0  ;;  %v859_v55 = vpop.f32.mrf.mxu1 }
 0x188   : > { %v870_v52 = vpop.f32.mrf.mxu2  ;;  %v892_v56 = vmul.f32 1.442695, %v889_v50  ;;  %v894_v57 = vmul.f32 1.442695, %v890_v51 }
 0x189   : > { %v876_v53 = vadd.f32 %v870_v52, %v808_v49 }
 0x18a   : > { %1138 = vpow2.f32 %v892_v56 }
 0x18b   : > { %v885_v58 = vadd.f32 %v881_v38, %v876_v53  ;;  %1140 = vpow2.f32 %v894_v57 }
 0x18d   : > { %v888_v59 = vmax.f32 %v885_v58, 0.0 }
 0x18f   : > { %v891_v60 = vsub.f32 0.0, %v888_v59 }
 0x190   : > { %v872_v61 = vpop.f32.mrf.mxu2  ;;  %v1139_v63 = vpop.eup %1138 }
 0x191   : > { %v896_v62 = vmul.f32 1.442695, %v891_v60  ;;  %v1141_v0 = vpop.eup %1140  ;;  %v898_v1 = vadd.f32 1.0, %v1139_v63 }
 0x192   : > { %v899_v2 = vadd.f32 1.0, %v1141_v0 }
 0x193   : > { %1142 = vpow2.f32 %v896_v62 }
 0x194   : > { %1144 = vrcp.f32 %v898_v1 }
 0x195   : > { %1146 = vrcp.f32 %v899_v2 }
 0x199   : > { %v1143_v3 = vpop.eup %1142 }
 0x19a   : > { %v900_v4 = vadd.f32 1.0, %v1143_v3  ;;  %v1145_v5 = vpop.eup %1144 }
 0x19b   : > { %v1147_v6 = vpop.eup %1146  ;;  %904 = vst [vmem:[%s246_s14] sm:$0xff] %v1145_v5 }
 0x19c   : > { %1148 = vrcp.f32 %v900_v4  ;;  %905 = vst [vmem:[%s246_s14 + $0x8] sm:$0xff] %v1147_v6 }
 0x1a2   : > { %v1149_v7 = vpop.eup %1148 }
 0x1a3   : > { %906 = vst [vmem:[%s246_s14 + $0x10] sm:$0xff] %v1149_v7 }
 0x1a4   : > { %1177 = shalt.err (!%p1174_p5)
}
 0x1a5   : > { %1071 = dma.vmem_to_hbm [thread:$0]  (%p1304_p4), %s924_s21, 384, %s926_s22, %s908_s18  }
 0x1a6 PF: > { %p1078_p6 = scmp.ge.s32.totalorder %s1228_s20, 2  ;;  %s937_s8 = sand.u32 1, %s1208_s15  }
 0x1a7   : > { %s938_s9 = scalar_lea.sflag [#allocation3], %s937_s8 }
 0x1a8   : > { %p1074_p7 = pnand %p1078_p6, %p1311_p8 }
 0x1aa   : > { %p1075_p9 = pneg %p1074_p7 }
 0x1ac   : > { %1203 = dma.done.wait (%p1075_p9), %s938_s9, 384  }
 0x1ad   : > { %1205 = vsyncadd (%p1075_p9), %s938_s9, 4294966912  ;;  %s17_s20 = sadd.s32 1, %s1228_s20   ;;  %s1484_s15 = smov %s1212_s16 }
 0x1ae   : > { %p14_p10 = scmp.ge.s32.totalorder %s17_s20, 4   ;;  %s1485_s16 = smov %s1216_s17 }
 0x1af   : > { %s1486_s17 = smov %s1317_s28  ;;  %s1487_s18 = smov %s1224_s19 }
 0x1b0   : > { %s1488_s19 = smov %s1490_s23  ;;  %16 = sbr.rel (!%p14_p10) target bundleno = 4 (0x4), region = 82 }
 0x1b5   :  { %944 = vsyncpa [#allocation3], 1 }
 0x1b6   :  { %946 = vsyncpa [#allocation3 + $0x1], 1 }

</bundles_post_ra>
